<compile_context>
chip_gen: v7x
topology: tpu7x:2x2x1
jax: 0.10.0
libtpu: 0.0.40
codegen_flags: <defaults>
</compile_context>

<pallas_src>
import jax
import jax.numpy as jnp
from jax.experimental import pallas as pl
from jax.experimental.pallas import tpu as pltpu

EPS = 1e-6


# ----------------------------------------------------------------------------- kernel


def _make_dice_kernel(chunk, unroll):
    """Kernel factory; `chunk` (lane width of the inner loop) is static."""

    def kernel(x_ref, t_ref, o_ref, inter_ref, psq_ref, tsq_ref):
        n = pl.program_id(0)          # batch tile
        j = pl.program_id(1)          # spatial tile

        @pl.when(jnp.logical_and(n == 0, j == 0))
        def _():
            inter_ref[...] = jnp.zeros_like(inter_ref)
            psq_ref[...] = jnp.zeros_like(psq_ref)
            tsq_ref[...] = jnp.zeros_like(tsq_ref)

        TN, C, T = x_ref.shape        # (batch-tile, channels, lanes), static
        n_chunks = T // chunk

        def body(kk, carry):
            lo = pl.multiple_of(kk * chunk, chunk)
            xs = x_ref[:, :, pl.ds(lo, chunk)].astype(jnp.float32)   # (TN, C, chunk)
            ts = t_ref[:, :, pl.ds(lo, chunk)].astype(jnp.float32)
            # softmax over the channel (sublane) axis
            m = jnp.max(xs, axis=1, keepdims=True)
            e = jnp.exp(xs - m)
            s = jnp.sum(e, axis=1, keepdims=True)
            p = e * pl.reciprocal(s, approx=True)                     # EUP reciprocal
            # lane-dense (C, chunk) partial sums; only elementwise adds per step,
            # the single cross-lane reduction happens once, in finalize.
            inter_ref[...] += jnp.sum(p * ts, axis=0)
            psq_ref[...] += jnp.sum(p * p, axis=0)
            tsq_ref[...] += jnp.sum(ts * ts, axis=0)
            return carry

        jax.lax.fori_loop(0, n_chunks, body, 0, unroll=unroll)

        @pl.when(jnp.logical_and(n == pl.num_programs(0) - 1,
                                 j == pl.num_programs(1) - 1))
        def _():
            # Single cross-lane reduction, once per kernel.
            inter = jnp.sum(inter_ref[...], axis=1, keepdims=True)                # (C, 1)
            denom = jnp.sum(psq_ref[...] + tsq_ref[...], axis=1, keepdims=True)   # (C, 1)
            dice = 2.0 * inter / jnp.maximum(denom, EPS)                          # (C, 1)
            o_ref[...] = 1.0 - jnp.sum(dice, keepdims=True) / C                   # (1, 1)

    return kernel


# ----------------------------------------------------------------------------- tiling


def _vmem_budgets():
    """(data_budget_bytes, vmem_limit_bytes) gated on the chip generation."""
    cap = None
    try:
        info = pltpu.get_tpu_info()
        cap = getattr(info, "vmem_capacity_bytes", None)
    except Exception:
        cap = None
    if cap is None or cap <= 0:
        cap = 64 << 20                      # conservative: v7x per-TC VMEM
    if cap >= (100 << 20):                  # v5e / v6e: 128 MiB physical VMEM
        return 40 << 20, 80 << 20
    return 20 << 20, 44 << 20               # v7x: 64 MiB per TensorCore


def _pick_tiles(N, C, HW, itemsize, data_budget):
    """Choose (tile_n, tile_hw). Per-step HBM payload = 2 inputs x 2 pipeline
    buffers x tile_n*C*tile_hw*itemsize, kept under `data_budget`."""
    if HW % 128 != 0:
        tile_hw = HW                        # full-extent lane block (ragged fallback)
    else:
        max_hw = max(128, data_budget // (4 * C * itemsize))
        cap = min(HW, (max_hw // 128) * 128)
        tile_hw = 128
        for t in range(128, cap + 1, 128):  # largest multiple-of-128 divisor of HW
            if HW % t == 0:
                tile_hw = t
    tile_n = 1
    if tile_hw == HW:
        # Whole image fits in one step: block over batch too (N is the leading,
        # contiguous axis, so this needs no layout change).
        per_image = max(1, 4 * C * HW * itemsize)
        cap_n = max(1, data_budget // per_image)
        for tn in range(1, min(N, cap_n) + 1):
            if N % tn == 0:
                tile_n = tn
    return tile_n, tile_hw


def _pick_chunk(tile_n, C, tile_hw):
    """Inner-loop lane width: widest {1024,512,256,128} that divides tile_hw and
    keeps per-temporary vreg footprint bounded."""
    if tile_hw % 128 != 0:
        return tile_hw                      # ragged: single whole-tile chunk
    for c in (1024, 512, 256, 128):
        if tile_hw % c == 0 and tile_n * C * c <= 8192:
            return c
    return 128


# ----------------------------------------------------------------------------- wrapper


def dice_loss(x, target):
    """x, target: (N, C, H, W) arrays (any real dtype). Returns scalar float32 loss."""
    N, C, H, W = x.shape
    HW = H * W

    # Free reshapes (contiguous); no transpose, no dtype upcast before DMA.
    xv = x.reshape(N, C, HW)
    tv = target.reshape(N, C, HW)

    itemsize = max(jnp.dtype(x.dtype).itemsize, jnp.dtype(target.dtype).itemsize)
    data_budget, vmem_limit = _vmem_budgets()
    tile_n, tile_hw = _pick_tiles(N, C, HW, itemsize, data_budget)
    chunk = _pick_chunk(tile_n, C, tile_hw)
    n_chunks = tile_hw // chunk
    unroll = max(1, min(4, n_chunks))
    assert N % tile_n == 0 and HW % tile_hw == 0

    grid = (N // tile_n, HW // tile_hw)
    block = (tile_n, C, tile_hw)
    idx_map = lambda n, j: (n, 0, j)

    total = N * C * HW
    cost = pl.CostEstimate(
        flops=10 * total,
        transcendentals=total,
        bytes_accessed=2 * total * itemsize + 4,
    )

    out = pl.pallas_call(
        _make_dice_kernel(chunk, unroll),
        out_shape=jax.ShapeDtypeStruct((1, 1), jnp.float32),
        grid_spec=pltpu.PrefetchScalarGridSpec(
            num_scalar_prefetch=0,
            grid=grid,
            in_specs=[
                pl.BlockSpec(block, idx_map),
                pl.BlockSpec(block, idx_map),
            ],
            out_specs=pl.BlockSpec((1, 1), lambda n, j: (0, 0)),
            scratch_shapes=[
                pltpu.VMEM((C, chunk), jnp.float32),  # sum(p*t) lane-dense accumulator
                pltpu.VMEM((C, chunk), jnp.float32),  # sum(p^2) lane-dense accumulator
                pltpu.VMEM((C, chunk), jnp.float32),  # sum(t^2) lane-dense accumulator
            ],
        ),
        compiler_params=pltpu.CompilerParams(
            # Shared accumulators + single last-step finalize require sequential grid.
            dimension_semantics=("arbitrary", "arbitrary"),
            vmem_limit_bytes=vmem_limit,
        ),
        cost_estimate=cost,
    )(xv, tv)
    return out[0, 0]


def dice_loss_ref(x, target):
    """Pure-JAX reference mirroring the PyTorch semantics."""
    p = jax.nn.softmax(x.astype(jnp.float32), axis=1)
    C = x.shape[1]
    pf = jnp.transpose(p, (1, 0, 2, 3)).reshape(C, -1)
    tf = jnp.transpose(target.astype(jnp.float32), (1, 0, 2, 3)).reshape(C, -1)
    intersect = jnp.sum(pf * tf, axis=-1)
    denom = jnp.sum(pf * pf, axis=-1) + jnp.sum(tf * tf, axis=-1)
    dice = 2.0 * intersect / jnp.maximum(denom, EPS)
    return 1.0 - jnp.mean(dice)


if __name__ == "__main__":
    key = jax.random.PRNGKey(0)
    k1, k2 = jax.random.split(key)

    N, C, H, W = 2, 4, 16, 16
    x = jax.random.normal(k1, (N, C, H, W), dtype=jnp.float32)
    # one-hot "ground truth" target, same shape as input (N, C, H, W)
    target = jax.nn.one_hot(
        jax.random.randint(k2, (N, H, W), 0, C), C, dtype=jnp.float32
    ).transpose(0, 3, 1, 2)

    loss = jax.block_until_ready(dice_loss(x, target))
    ref = jax.block_until_ready(dice_loss_ref(x, target))

    # approx reciprocal (EUP) in the softmax => slightly looser tolerance
    assert jnp.allclose(loss, ref, rtol=1e-3, atol=1e-3), (loss, ref)
    print("KERNEL_OK")
</pallas_src>

<mosaic_0001>
module attributes {stable_mosaic.version = 11 : i64} {
  func.func @kernel(%arg0: i32, %arg1: i32, %arg2: memref<2x4x256xf32, #tpu.memory_space<vmem>>, %arg3: memref<2x4x256xf32, #tpu.memory_space<vmem>>, %arg4: memref<1x1xf32, #tpu.memory_space<vmem>>, %arg5: memref<4x256xf32, #tpu.memory_space<vmem>>, %arg6: memref<4x256xf32, #tpu.memory_space<vmem>>, %arg7: memref<4x256xf32, #tpu.memory_space<vmem>>) attributes {dimension_semantics = [#tpu.dimension_semantics<arbitrary>, #tpu.dimension_semantics<arbitrary>], iteration_bounds = array<i64: 1, 1>, scalar_prefetch = 0 : i64, scratch_operands = 3 : i64, tpu.core_type = #tpu.core_type<tc>, window_params = [{transform_indices = @transform_0, window_bounds = array<i64: 2, 4, 256>}, {transform_indices = @transform_1, window_bounds = array<i64: 2, 4, 256>}, {pipeline_mode = #tpu.pipeline_mode<synchronous>, transform_indices = @transform_2, window_bounds = array<i64: 1, 1>}]} {
    %c0_i32 = arith.constant 0 : i32
    %0 = arith.cmpi eq, %arg0, %c0_i32 : i32
    %c0_i32_0 = arith.constant 0 : i32
    %1 = arith.cmpi eq, %arg1, %c0_i32_0 : i32
    %2 = arith.andi %0, %1 : i1
    %3 = arith.extui %2 : i1 to i32
    %c0_i32_1 = arith.constant 0 : i32
    %4 = arith.cmpi ne, %3, %c0_i32_1 : i32
    scf.if %4 {
      %cst_25 = arith.constant 0.000000e+00 : f32
      %41 = vector.broadcast %cst_25 : f32 to vector<4x256xf32>
      %c0_26 = arith.constant 0 : index
      %c0_27 = arith.constant 0 : index
      %42 = vector.load %arg5[%c0_26, %c0_27] : memref<4x256xf32, #tpu.memory_space<vmem>>, vector<4x256xf32>
      tpu.vector_store %arg5[%c0_26, %c0_27], %41 {strides = array<i32>} : memref<4x256xf32, #tpu.memory_space<vmem>>, vector<4x256xf32>,
      %cst_28 = arith.constant 0.000000e+00 : f32
      %43 = vector.broadcast %cst_28 : f32 to vector<4x256xf32>
      %c0_29 = arith.constant 0 : index
      %c0_30 = arith.constant 0 : index
      %44 = vector.load %arg6[%c0_29, %c0_30] : memref<4x256xf32, #tpu.memory_space<vmem>>, vector<4x256xf32>
      tpu.vector_store %arg6[%c0_29, %c0_30], %43 {strides = array<i32>} : memref<4x256xf32, #tpu.memory_space<vmem>>, vector<4x256xf32>,
      %cst_31 = arith.constant 0.000000e+00 : f32
      %45 = vector.broadcast %cst_31 : f32 to vector<4x256xf32>
      %c0_32 = arith.constant 0 : index
      %c0_33 = arith.constant 0 : index
      %46 = vector.load %arg7[%c0_32, %c0_33] : memref<4x256xf32, #tpu.memory_space<vmem>>, vector<4x256xf32>
      tpu.vector_store %arg7[%c0_32, %c0_33], %45 {strides = array<i32>} : memref<4x256xf32, #tpu.memory_space<vmem>>, vector<4x256xf32>,
    } else {
    }
    %c0_i32_2 = arith.constant 0 : i32
    %c256_i32 = arith.constant 256 : i32
    %5 = arith.muli %c0_i32_2, %c256_i32 : i32
    %6 = tpu.assume_multiple %5, 256 : i32
    %c0 = arith.constant 0 : index
    %c0_3 = arith.constant 0 : index
    %7 = arith.index_cast %6 : i32 to index
    %8 = vector.load %arg2[%c0, %c0_3, %7] : memref<2x4x256xf32, #tpu.memory_space<vmem>>, vector<2x4x256xf32>
    %c0_4 = arith.constant 0 : index
    %c0_5 = arith.constant 0 : index
    %9 = arith.index_cast %6 : i32 to index
    %10 = vector.load %arg3[%c0_4, %c0_5, %9] : memref<2x4x256xf32, #tpu.memory_space<vmem>>, vector<2x4x256xf32>
    %cst = arith.constant dense<0xFF800000> : vector<2x256xf32>
    %11 = vector.multi_reduction <maximumf>, %8, %cst [1] : vector<2x4x256xf32> to vector<2x256xf32>
    %12 = vector.shape_cast %11 : vector<2x256xf32> to vector<2x1x256xf32>
    %13 = vector.broadcast %12 : vector<2x1x256xf32> to vector<2x4x256xf32>
    %14 = arith.subf %8, %13 : vector<2x4x256xf32>
    %15 = math.exp %14 : vector<2x4x256xf32>
    %cst_6 = arith.constant dense<0.000000e+00> : vector<2x256xf32>
    %16 = vector.multi_reduction <add>, %15, %cst_6 [1] : vector<2x4x256xf32> to vector<2x256xf32>
    %17 = vector.shape_cast %16 : vector<2x256xf32> to vector<2x1x256xf32>
    %18 = tpu.reciprocal %17 {approx = true} : vector<2x1x256xf32> -> vector<2x1x256xf32>
    %19 = vector.broadcast %18 : vector<2x1x256xf32> to vector<2x4x256xf32>
    %20 = arith.mulf %15, %19 : vector<2x4x256xf32>
    %c0_7 = arith.constant 0 : index
    %c0_8 = arith.constant 0 : index
    %21 = vector.load %arg5[%c0_7, %c0_8] : memref<4x256xf32, #tpu.memory_space<vmem>>, vector<4x256xf32>
    %22 = arith.mulf %20, %10 : vector<2x4x256xf32>
    %cst_9 = arith.constant dense<0.000000e+00> : vector<4x256xf32>
    %23 = vector.multi_reduction <add>, %22, %cst_9 [0] : vector<2x4x256xf32> to vector<4x256xf32>
    %24 = arith.addf %21, %23 : vector<4x256xf32>
    %c0_10 = arith.constant 0 : index
    %c0_11 = arith.constant 0 : index
    %25 = vector.load %arg5[%c0_10, %c0_11] : memref<4x256xf32, #tpu.memory_space<vmem>>, vector<4x256xf32>
    tpu.vector_store %arg5[%c0_10, %c0_11], %24 {strides = array<i32>} : memref<4x256xf32, #tpu.memory_space<vmem>>, vector<4x256xf32>,
    %c0_12 = arith.constant 0 : index
    %c0_13 = arith.constant 0 : index
    %26 = vector.load %arg6[%c0_12, %c0_13] : memref<4x256xf32, #tpu.memory_space<vmem>>, vector<4x256xf32>
    %27 = arith.mulf %20, %20 : vector<2x4x256xf32>
    %cst_14 = arith.constant dense<0.000000e+00> : vector<4x256xf32>
    %28 = vector.multi_reduction <add>, %27, %cst_14 [0] : vector<2x4x256xf32> to vector<4x256xf32>
    %29 = arith.addf %26, %28 : vector<4x256xf32>
    %c0_15 = arith.constant 0 : index
    %c0_16 = arith.constant 0 : index
    %30 = vector.load %arg6[%c0_15, %c0_16] : memref<4x256xf32, #tpu.memory_space<vmem>>, vector<4x256xf32>
    tpu.vector_store %arg6[%c0_15, %c0_16], %29 {strides = array<i32>} : memref<4x256xf32, #tpu.memory_space<vmem>>, vector<4x256xf32>,
    %c0_17 = arith.constant 0 : index
    %c0_18 = arith.constant 0 : index
    %31 = vector.load %arg7[%c0_17, %c0_18] : memref<4x256xf32, #tpu.memory_space<vmem>>, vector<4x256xf32>
    %32 = arith.mulf %10, %10 : vector<2x4x256xf32>
    %cst_19 = arith.constant dense<0.000000e+00> : vector<4x256xf32>
    %33 = vector.multi_reduction <add>, %32, %cst_19 [0] : vector<2x4x256xf32> to vector<4x256xf32>
    %34 = arith.addf %31, %33 : vector<4x256xf32>
    %c0_20 = arith.constant 0 : index
    %c0_21 = arith.constant 0 : index
    %35 = vector.load %arg7[%c0_20, %c0_21] : memref<4x256xf32, #tpu.memory_space<vmem>>, vector<4x256xf32>
    tpu.vector_store %arg7[%c0_20, %c0_21], %34 {strides = array<i32>} : memref<4x256xf32, #tpu.memory_space<vmem>>, vector<4x256xf32>,
    %c1_i32 = arith.constant 1 : i32
    %c0_i32_22 = arith.constant 0 : i32
    %36 = arith.cmpi eq, %arg0, %c0_i32_22 : i32
    %c0_i32_23 = arith.constant 0 : i32
    %37 = arith.cmpi eq, %arg1, %c0_i32_23 : i32
    %38 = arith.andi %36, %37 : i1
    %39 = arith.extui %38 : i1 to i32
    %c0_i32_24 = arith.constant 0 : i32
    %40 = arith.cmpi ne, %39, %c0_i32_24 : i32
    scf.if %40 {
      %c0_25 = arith.constant 0 : index
      %c0_26 = arith.constant 0 : index
      %41 = vector.load %arg5[%c0_25, %c0_26] : memref<4x256xf32, #tpu.memory_space<vmem>>, vector<4x256xf32>
      %cst_27 = arith.constant dense<0.000000e+00> : vector<4xf32>
      %42 = vector.multi_reduction <add>, %41, %cst_27 [1] : vector<4x256xf32> to vector<4xf32>
      %43 = vector.shape_cast %42 : vector<4xf32> to vector<4x1xf32>
      %c0_28 = arith.constant 0 : index
      %c0_29 = arith.constant 0 : index
      %44 = vector.load %arg6[%c0_28, %c0_29] : memref<4x256xf32, #tpu.memory_space<vmem>>, vector<4x256xf32>
      %c0_30 = arith.constant 0 : index
      %c0_31 = arith.constant 0 : index
      %45 = vector.load %arg7[%c0_30, %c0_31] : memref<4x256xf32, #tpu.memory_space<vmem>>, vector<4x256xf32>
      %46 = arith.addf %44, %45 : vector<4x256xf32>
      %cst_32 = arith.constant dense<0.000000e+00> : vector<4xf32>
      %47 = vector.multi_reduction <add>, %46, %cst_32 [1] : vector<4x256xf32> to vector<4xf32>
      %48 = vector.shape_cast %47 : vector<4xf32> to vector<4x1xf32>
      %cst_33 = arith.constant 2.000000e+00 : f32
      %49 = vector.broadcast %cst_33 : f32 to vector<4x1xf32>
      %50 = arith.mulf %49, %43 : vector<4x1xf32>
      %cst_34 = arith.constant 9.99999997E-7 : f32
      %51 = vector.broadcast %cst_34 : f32 to vector<4x1xf32>
      %52 = arith.maximumf %48, %51 : vector<4x1xf32>
      %53 = arith.divf %50, %52 : vector<4x1xf32>
      %54 = vector.shape_cast %53 : vector<4x1xf32> to vector<1x4x1xf32>
      %cst_35 = arith.constant dense<0.000000e+00> : vector<1xf32>
      %55 = vector.multi_reduction <add>, %54, %cst_35 [1, 2] : vector<1x4x1xf32> to vector<1xf32>
      %56 = vector.shape_cast %55 : vector<1xf32> to vector<1x1x1xf32>
      %57 = vector.extract %56[0, 0, 0] : f32 from vector<1x1x1xf32>
      %58 = vector.broadcast %57 : f32 to vector<1x1xf32>
      %cst_36 = arith.constant 4.000000e+00 : f32
      %59 = vector.broadcast %cst_36 : f32 to vector<1x1xf32>
      %60 = arith.divf %58, %59 : vector<1x1xf32>
      %cst_37 = arith.constant 1.000000e+00 : f32
      %61 = vector.broadcast %cst_37 : f32 to vector<1x1xf32>
      %62 = arith.subf %61, %60 : vector<1x1xf32>
      %c0_38 = arith.constant 0 : index
      %c0_39 = arith.constant 0 : index
      %63 = vector.load %arg4[%c0_38, %c0_39] : memref<1x1xf32, #tpu.memory_space<vmem>>, vector<1x1xf32>
      tpu.vector_store %arg4[%c0_38, %c0_39], %62 {strides = array<i32>} : memref<1x1xf32, #tpu.memory_space<vmem>>, vector<1x1xf32>,
    } else {
    }
    return
  }
  func.func @transform_0(%arg0: i32, %arg1: i32) -> (i32, i32, i32) {
    %c0_i32 = arith.constant 0 : i32
    %c0_i32_0 = arith.constant 0 : i32
    return %arg0, %c0_i32, %arg1 : i32, i32, i32
  }
  func.func @transform_1(%arg0: i32, %arg1: i32) -> (i32, i32, i32) {
    %c0_i32 = arith.constant 0 : i32
    %c0_i32_0 = arith.constant 0 : i32
    return %arg0, %c0_i32, %arg1 : i32, i32, i32
  }
  func.func @transform_2(%arg0: i32, %arg1: i32) -> (i32, i32) {
    %c0_i32 = arith.constant 0 : i32
    %c0_i32_0 = arith.constant 0 : i32
    %c0_i32_1 = arith.constant 0 : i32
    return %c0_i32, %c0_i32_0 : i32, i32
  }
}

</mosaic_0001>

<bundles_post_ra>
// kernel: tpu_custom_call.1
= control target key start
LH: loop header
LB: loop body
LE: loop exit
PB: predicated region body
PF: predicated region fallthrough
CT: control target
= control target key end

     0   :  { %7 = vsyncpa [#allocation6], 0  ;;  %s448_s0 = inlined_call_operand.hbm [shape: f32[2,4,256], index: 0, kind: input, shape index: {}]   ;;  %s449_s1 = inlined_call_operand.hbm [shape: f32[2,4,256], index: 1, kind: input, shape index: {}]   ;;  %s450_s2 = inlined_call_operand.hbm [shape: f32[1,1], index: 2, kind: output, shape index: {}]  }
   0x1   :  { %8 = vsyncpa [#allocation9], 0 }
   0x2   :  { %9 = vsyncpa [#allocation7], 0  ;;  %s368_s9 = smov [#allocation5]   ;;  %s296_s13 = scalar_lea.hbm %s448_s0, 256 }
   0x3   :  { %s15_s10 = sshll.u32 %s368_s9, 4  ;;  %p297_p0 = scmp.ne.s32.totalorder %s448_s0, %s296_s13  ;;  %s16_s10 = int_to_ptr.vmem [resolvable:$true] %s15_s10 }
   0x4   :  { %p300_p1 = scmp.lt.u32.totalorder %s296_s13, %s448_s0 }
   0x6   :  { %p302_p2 = pnand %p300_p1, %p297_p0 }
   0x8   :  { %305 = shalt.err (!%p302_p2)
}
   0x9   :  { %s306_s18 = scalar_lea.vmem %s16_s10, 256  ;;  %p311_p4 = scmp.lt.s32.totalorder %s16_s10, %s16_s10 }
   0xa   :  { %p307_p3 = scmp.ne.s32.totalorder %s16_s10, %s306_s18  ;;  %p312_p5 = scmp.lt.s32.totalorder %s306_s18, %s306_s18 }
   0xc   :  { %p313_p6 = por %p312_p5, %p311_p4 }
   0xe   :  { %p314_p7 = pnand %p313_p6, %p307_p3 }
  0x10   :  { %317 = shalt.err (!%p314_p7)
}
  0x11   :  { %s369_s19 = smov 128   ;;  %s370_s20 = smov 8  }
  0x12   :  { %21 = dma.hbm_to_vmem [thread:$0]  %s448_s0, 256, %s16_s10, [#allocation6], %s369_s19, %s369_s19, %s370_s20  }
  0x13   :  { %s371_s23 = smov [#allocation8]   ;;  %s318_s27 = scalar_lea.hbm %s449_s1, 256 }
  0x14   :  { %s27_s24 = sshll.u32 %s371_s23, 4  ;;  %p319_p8 = scmp.ne.s32.totalorder %s449_s1, %s318_s27  ;;  %s28_s24 = int_to_ptr.vmem [resolvable:$true] %s27_s24 }
  0x15   :  { %p322_p9 = scmp.lt.u32.totalorder %s318_s27, %s449_s1 }
  0x17   :  { %p324_p10 = pnand %p322_p9, %p319_p8 }
  0x19   :  { %327 = shalt.err (!%p324_p10)
}
  0x1a   :  { %s328_s4 = scalar_lea.vmem %s28_s24, 256  ;;  %p333_p12 = scmp.lt.s32.totalorder %s28_s24, %s28_s24 }
  0x1b   :  { %p329_p11 = scmp.ne.s32.totalorder %s28_s24, %s328_s4  ;;  %p334_p13 = scmp.lt.s32.totalorder %s328_s4, %s328_s4 }
  0x1d   :  { %p335_p0 = por %p334_p13, %p333_p12 }
  0x1f   :  { %p336_p1 = pnand %p335_p0, %p329_p11 }
  0x21   :  { %339 = shalt.err (!%p336_p1)
}
  0x22   :  { %33 = dma.hbm_to_vmem [thread:$0]  %s449_s1, 256, %s28_s24, [#allocation9], %s369_s19, %s369_s19, %s370_s20  }
  0x23   :  { %362 = dma.done.wait [#allocation6], 256  }
  0x24   :  { %363 = vsyncadd [#allocation6], 4294967040 }
  0x25   :  { %364 = dma.done.wait [#allocation9], 256  }
  0x26   :  { %365 = vsyncadd [#allocation9], 4294967040  ;;  %vm59_vm0 = vcmask 1043456   ;;  %v49_v0 = vld [vmem:[#allocation5] sm:$0xff]  ;;  %v50_v1 = vld [vmem:[#allocation5 + $0x8] sm:$0xff]  ;;  %vm239_vm1 = vcmask 3072  }
  0x27   :  { %v55_v2 = vcombine.high %v49_v0, %v49_v0  ;;  %v56_v3 = vcombine.high %v50_v1, %v50_v1  ;;  %v60_v4 = vsel %vm59_vm0, %v49_v0, -inf  ;;  %v74_v5 = vsel %vm59_vm0, %v50_v1, -inf  ;;  %s372_s6 = smov [#allocation10]  }
  0x28   :  { %v61_v6 = vrot.slane %v60_v4, 4  ;;  %v75_v7 = vrot.slane %v74_v5, 4  ;;  %s262_s7 = sshll.u32 %s372_s6, 4  ;;  %vm254_vm2 = vcmask 0   ;;  %s263_s7 = int_to_ptr.vmem [resolvable:$true] %s262_s7 }
  0x29   :  { %v67_v8 = vsel %vm59_vm0, %v55_v2, -inf  ;;  %v81_v9 = vsel %vm59_vm0, %v56_v3, -inf  ;;  %s340_s8 = scalar_lea.vmem %s263_s7, 16  ;;  %s344_s9 = scalar_lea.vmem %s263_s7, 32 }
  0x2a   :  { %v62_v10 = vmax.f32 %v60_v4, %v61_v6  ;;  %v68_v11 = vrot.slane %v67_v8, 4  ;;  %v76_v12 = vmax.f32 %v74_v5, %v75_v7  ;;  %v82_v13 = vrot.slane %v81_v9, 4  ;;  %v51_v6 = vld [vmem:[#allocation8] sm:$0xff]  ;;  %v52_v7 = vld [vmem:[#allocation8 + $0x8] sm:$0xff]  ;;  %p341_p2 = scmp.ne.s32.totalorder %s263_s7, %s340_s8  ;;  %p345_p3 = scmp.lt.s32.totalorder %s263_s7, %s263_s7 }
  0x2b   :  { %p346_p4 = scmp.lt.s32.totalorder %s344_s9, %s340_s8 }
  0x2c   :  { %v63_v14 = vrot.slane %v62_v10, 2  ;;  %v69_v15 = vmax.f32 %v67_v8, %v68_v11  ;;  %v77_v16 = vrot.slane %v76_v12, 2  ;;  %v83_v17 = vmax.f32 %v81_v9, %v82_v13 }
  0x2d   :  { %v193_v8 = vmul.f32 %v51_v6, %v51_v6  ;;  %v194_v9 = vmul.f32 %v52_v7, %v52_v7  ;;  %p347_p5 = por %p346_p4, %p345_p3 }
  0x2e   :  { %v64_v18 = vmax.f32 %v62_v10, %v63_v14  ;;  %v70_v19 = vrot.slane %v69_v15, 2  ;;  %v78_v20 = vmax.f32 %v76_v12, %v77_v16  ;;  %v84_v21 = vrot.slane %v83_v17, 2 }
  0x2f   :  { %v197_v12 = vcombine.high %v193_v8, %v193_v8  ;;  %v198_v13 = vcombine.high %v194_v9, %v194_v9  ;;  %p348_p6 = pnand %p347_p5, %p341_p2 }
  0x30   :  { %v65_v22 = vrot.slane %v64_v18, 1  ;;  %v71_v23 = vmax.f32 %v69_v15, %v70_v19  ;;  %v79_v24 = vrot.slane %v78_v20, 1  ;;  %v85_v25 = vmax.f32 %v83_v17, %v84_v21 }
  0x31   :  { %v204_v21 = vsel %vm59_vm0, %v197_v12, 0.0 }
  0x32   :  { %v66_v26 = vmax.f32 %v64_v18, %v65_v22  ;;  %v72_v27 = vrot.slane %v71_v23, 1  ;;  %v80_v28 = vmax.f32 %v78_v20, %v79_v24  ;;  %v86_v29 = vrot.slane %v85_v25, 1 }
  0x33   :  { %v201_v18 = vsel %vm59_vm0, %v193_v8, 0.0  ;;  %v202_v20 = vsel %vm59_vm0, %v194_v9, 0.0  ;;  %v205_v22 = vsel %vm59_vm0, %v198_v13, 0.0 }
  0x34   :  { %v73_v30 = vmax.f32 %v71_v23, %v72_v27  ;;  %v87_v31 = vmax.f32 %v85_v25, %v86_v29  ;;  %v203_v27 = vadd.f32 %v202_v20, %v201_v18 }
  0x36   :  { %v92_v32 = vcombine.low %v66_v26, %v73_v30  ;;  %v93_v33 = vcombine.low %v80_v28, %v87_v31  ;;  %v206_v28 = vadd.f32 %v205_v22, %v204_v21 }
  0x38   :  { %v96_v34 = vsub.f32 %v49_v0, %v92_v32  ;;  %v97_v35 = vsub.f32 %v50_v1, %v93_v33 }
  0x3a   :  { %v98_v36 = vmul.f32 1.442695, %v96_v34  ;;  %v100_v37 = vmul.f32 1.442695, %v97_v35 }
  0x3c   :  { %282 = vpow2.f32 %v98_v36 }
  0x3d   :  { %284 = vpow2.f32 %v100_v37 }
  0x46   :  { %v283_v38 = vpop.eup %282 }
  0x47   :  { %v285_v39 = vpop.eup %284  ;;  %v104_v40 = vcombine.high %v283_v38, %v283_v38  ;;  %v108_v41 = vsel %vm59_vm0, %v283_v38, 0.0 }
  0x48   :  { %v105_v42 = vcombine.high %v285_v39, %v285_v39  ;;  %v109_v43 = vrot.slane %v108_v41, 4  ;;  %v122_v44 = vsel %vm59_vm0, %v285_v39, 0.0 }
  0x49   :  { %v115_v45 = vsel %vm59_vm0, %v104_v40, 0.0  ;;  %v123_v46 = vrot.slane %v122_v44, 4 }
  0x4a   :  { %v110_v47 = vadd.f32 %v109_v43, %v108_v41  ;;  %v116_v48 = vrot.slane %v115_v45, 4  ;;  %v129_v49 = vsel %vm59_vm0, %v105_v42, 0.0 }
  0x4b   :  { %v124_v50 = vadd.f32 %v123_v46, %v122_v44  ;;  %v130_v51 = vrot.slane %v129_v49, 4  ;;  %v209_v44 = vcombine.low %v203_v27, %v206_v28 }
  0x4c   :  { %v111_v52 = vrot.slane %v110_v47, 2  ;;  %v117_v53 = vadd.f32 %v116_v48, %v115_v45 }
  0x4d   :  { %v125_v54 = vrot.slane %v124_v50, 2  ;;  %v131_v55 = vadd.f32 %v130_v51, %v129_v49 }
  0x4e   :  { %v112_v56 = vadd.f32 %v111_v52, %v110_v47  ;;  %v118_v57 = vrot.slane %v117_v53, 2 }
  0x4f   :  { %v126_v58 = vadd.f32 %v125_v54, %v124_v50  ;;  %v132_v59 = vrot.slane %v131_v55, 2 }
  0x50   :  { %v113_v60 = vrot.slane %v112_v56, 1  ;;  %v119_v61 = vadd.f32 %v118_v57, %v117_v53 }
  0x51   :  { %v127_v62 = vrot.slane %v126_v58, 1  ;;  %v133_v63 = vadd.f32 %v132_v59, %v131_v55 }
  0x52   :  { %v114_v0 = vadd.f32 %v113_v60, %v112_v56  ;;  %v120_v1 = vrot.slane %v119_v61, 1 }
  0x53   :  { %v128_v2 = vadd.f32 %v127_v62, %v126_v58  ;;  %v134_v3 = vrot.slane %v133_v63, 1 }
  0x54   :  { %v121_v4 = vadd.f32 %v120_v1, %v119_v61  ;;  %286 = vrcp.f32 %v114_v0 }
  0x55   :  { %v135_v5 = vadd.f32 %v134_v3, %v133_v63  ;;  %288 = vrcp.f32 %v128_v2 }
  0x56   :  { %290 = vrcp.f32 %v121_v4 }
  0x57   :  { %292 = vrcp.f32 %v135_v5 }
  0x5e   :  { %v287_v10 = vpop.eup %286 }
  0x5f   :  { %v289_v11 = vpop.eup %288 }
  0x60   :  { %v291_v14 = vpop.eup %290 }
  0x61   :  { %v293_v15 = vpop.eup %292  ;;  %v144_v16 = vcombine.low %v287_v10, %v291_v14 }
  0x62   :  { %v145_v17 = vcombine.low %v289_v11, %v293_v15 }
  0x63   :  { %v148_v19 = vmul.f32 %v283_v38, %v144_v16 }
  0x64   :  { %v149_v23 = vmul.f32 %v285_v39, %v145_v17 }
  0x65   :  { %v172_v24 = vmul.f32 %v148_v19, %v148_v19  ;;  %v151_v25 = vmul.f32 %v148_v19, %v51_v6 }
  0x66   :  { %v173_v26 = vmul.f32 %v149_v23, %v149_v23  ;;  %v152_v29 = vmul.f32 %v149_v23, %v52_v7 }
  0x67   :  { %v176_v30 = vcombine.high %v172_v24, %v172_v24  ;;  %v180_v31 = vsel %vm59_vm0, %v172_v24, 0.0  ;;  %v155_v32 = vcombine.high %v151_v25, %v151_v25  ;;  %v159_v33 = vsel %vm59_vm0, %v151_v25, 0.0 }
  0x68   :  { %v177_v34 = vcombine.high %v173_v26, %v173_v26  ;;  %v181_v35 = vsel %vm59_vm0, %v173_v26, 0.0  ;;  %v156_v36 = vcombine.high %v152_v29, %v152_v29  ;;  %v160_v37 = vsel %vm59_vm0, %v152_v29, 0.0 }
  0x69   :  { %v182_v38 = vadd.f32 %v181_v35, %v180_v31  ;;  %v183_v39 = vsel %vm59_vm0, %v176_v30, 0.0  ;;  %v162_v40 = vsel %vm59_vm0, %v155_v32, 0.0  ;;  %v161_v45 = vadd.f32 %v160_v37, %v159_v33 }
  0x6a   :  { %v184_v41 = vsel %vm59_vm0, %v177_v34, 0.0  ;;  %v163_v42 = vsel %vm59_vm0, %v156_v36, 0.0 }
  0x6b   :  { %v185_v43 = vadd.f32 %v184_v41, %v183_v39  ;;  %v164_v46 = vadd.f32 %v163_v42, %v162_v40 }
  0x6d   :  { %v188_v47 = vcombine.low %v182_v38, %v185_v43  ;;  %v167_v49 = vcombine.low %v161_v45, %v164_v46  ;;  %v272_v50 = vcombine.low %v164_v46, %v164_v46 }
  0x6f   :  { %v226_v48 = vadd.f32 %v209_v44, %v188_v47  ;;  %v219_v54 = vsel %vm59_vm0, %v167_v49, 0.0  ;;  %v220_v55 = vsel %vm59_vm0, %v272_v50, 0.0 }
  0x70   :  { %v221_v57 = vadd.f32 %v220_v55, %v219_v54 }
  0x71   :  { %v228_v51 = vcombine.high %v226_v48, %v226_v48  ;;  %v230_v52 = vsel %vm59_vm0, %v226_v48, 0.0 }
  0x73   :  { %v231_v53 = vsel %vm59_vm0, %v228_v51, 0.0 }
  0x74   :  { %v232_v56 = vadd.f32 %v231_v53, %v230_v52 }
  0x76   :  { %233 = vadd.xlane.f32.xlu0 %v232_v56 }
  0x7a   :  { %222 = vadd.xlane.f32.xlu0 %v221_v57 }
 0x103   :  { %v234_v58 = vpop.xlane.xlu0 %233 }
 0x104   :  { %v236_v59 = vmax.f32 %v234_v58, 1e-06 }
 0x106   :  { %294 = vrcp.f32 %v236_v59 }
 0x107   :  { %v223_v60 = vpop.xlane.xlu0 %222 }
 0x108   :  { %v235_v61 = vmul.f32 2.0, %v223_v60 }
 0x110   :  { %v295_v62 = vpop.eup %294 }
 0x111   :  { %v238_v63 = vmul.f32 %v295_v62, %v235_v61 }
 0x113   :  { %v240_v0 = vsel %vm239_vm1, %v238_v63, 0.0 }
 0x114   :  { %241 = vadd.xlane.f32.xlu1 %v240_v0 }
 0x1a1   :  { %v242_v1 = vpop.xlane.xlu1 %241 }
 0x1a2   :  { %v243_v2 = vrot.slane %v242_v1, 4 }
 0x1a4   :  { %v244_v3 = vadd.f32 %v243_v2, %v242_v1 }
 0x1a6   :  { %v245_v4 = vrot.slane %v244_v3, 2 }
 0x1a8   :  { %v246_v5 = vadd.f32 %v245_v4, %v244_v3 }
 0x1aa   :  { %v247_v6 = vrot.slane %v246_v5, 1 }
 0x1ac   :  { %v248_v7 = vadd.f32 %v247_v6, %v246_v5 }
 0x1ae   :  { %273 = vpush %v248_v7 }
 0x1df   :  { %s274_s1 = spop %273 }
 0x1e0   :  { %v250_v8 = vstv %s274_s1 }
 0x1e1   :  { %v252_v9 = vmul.f32 0.25, %v250_v8 }
 0x1e3   :  { %v253_v10 = vsub.f32 1.0, %v252_v9 }
 0x1e5   :  { %255 = vst.msk [vmem:[#allocation10] sm:$0x1] %vm254_vm2, %v253_v10 }
 0x1e6   :  { %351 = shalt.err (!%p348_p6)
}
 0x1e7   :  { %s352_s12 = scalar_lea.hbm %s450_s2, 16 }
 0x1e8   :  { %p353_p7 = scmp.ne.s32.totalorder %s450_s2, %s352_s12  ;;  %p356_p8 = scmp.lt.u32.totalorder %s352_s12, %s450_s2 }
 0x1ea   :  { %p358_p9 = pnand %p356_p8, %p353_p7 }
 0x1ec   :  { %361 = shalt.err (!%p358_p9)
}
 0x1ed   :  { %265 = dma.vmem_to_hbm [thread:$0]  %s263_s7, 16, %s450_s2, [#allocation7]  }
 0x1ee   :  { %366 = dma.done.wait [#allocation7], 16  }
 0x1ef   :  { %367 = vsyncadd [#allocation7], 4294967280 }
 0x1f0   :  { %269 = vsyncpa [#allocation6], 1 }
 0x1f1   :  { %270 = vsyncpa [#allocation9], 1 }
 0x1f2   :  { %271 = vsyncpa [#allocation7], 1 }

</bundles_post_ra>
